<compile_context>
chip_gen: v7x
topology: tpu7x:2x2x1
jax: 0.10.0
libtpu: 0.0.40
codegen_flags: <defaults>
</compile_context>

<pallas_src>
import jax
import jax.numpy as jnp
import numpy as np
from jax.experimental import pallas as pl
from jax.experimental.pallas import tpu as pltpu

_LANE_BLOCK = 1024  # lanes per grid step when the folded (xyz*batch) axis is large


def _extra_joints_kernel(w_ref, x_ref, o_ref):
    # w_ref : VMEM [J, 3, 1]   f32  barycentric weights
    # x_ref : VMEM [J, 3, Lb]  f32  gathered triangle vertices (lanes = xyz*batch)
    # o_ref : VMEM [J, Lb]     f32  weighted extra joints (lanes = xyz*batch)
    x = x_ref[...]                                    # (J, 3, Lb)
    w = w_ref[...]                                    # (J, 3, 1) -> lane broadcast
    # Barycentric reduction over k: one vectorized multiply + sublane reduce,
    # written with a single (unmasked, lane-dense) store.
    o_ref[...] = jnp.sum(x * w, axis=1).astype(o_ref.dtype)


@jax.jit
def joints_from_vertices(vertices, faces, face_ids, bcs):
    """vertices: [B, V, 3] f32, faces: [F, 3] i32, face_ids: [J] i32, bcs: [J, 3] f32."""
    B, V, _ = vertices.shape
    J = bcs.shape[0]
    if J < 1:
        # PyTorch module returns [] in this case.
        return jnp.zeros((B, 0, 3), vertices.dtype)

    # --- JAX-side glue: gather only the J*3 needed vertex rows. ------------
    vertex_ids = faces[face_ids].reshape(-1).astype(jnp.int32)        # [J*3]
    vertex_ids = jnp.clip(vertex_ids, 0, V - 1)                       # bounds safety
    tri = jnp.take(vertices, vertex_ids, axis=1)                      # [B, J*3, 3]

    # Lane-dense layout: [b, j, k, c] -> [j, k, c, b] -> [J, 3, 3*B],
    # lane index l = c*B + b. Each lane is independent in the k-reduction.
    tri = tri.reshape(B, J, 3, 3)                                     # [b, j, k, c]
    tri = jnp.transpose(tri, (1, 2, 3, 0))                            # [j, k, c, b]
    lanes = 3 * B
    tri = tri.reshape(J, 3, lanes).astype(jnp.float32)

    # Lane tiling: single grid step for small problems, 1024-lane blocks
    # (multiple parallel grid steps) for large batches.
    if lanes <= 2 * _LANE_BLOCK:
        lane_block = lanes
        lanes_padded = lanes
    else:
        lane_block = _LANE_BLOCK
        lanes_padded = ((lanes + lane_block - 1) // lane_block) * lane_block
        tri = jnp.pad(tri, ((0, 0), (0, 0), (0, lanes_padded - lanes)))
    grid = (lanes_padded // lane_block,)

    w = bcs.astype(jnp.float32).reshape(J, 3, 1)

    out = pl.pallas_call(
        _extra_joints_kernel,
        out_shape=jax.ShapeDtypeStruct((J, lanes_padded), jnp.float32),
        grid=grid,
        in_specs=[
            pl.BlockSpec((J, 3, 1), lambda i: (0, 0, 0)),             # weights
            pl.BlockSpec((J, 3, lane_block), lambda i: (0, 0, i)),    # triangles
        ],
        out_specs=pl.BlockSpec((J, lane_block), lambda i: (0, i)),
        compiler_params=pltpu.CompilerParams(
            dimension_semantics=("parallel",)),
    )(w, tri)

    # Undo the lane folding: [J, 3*B] -> [J, 3, B] -> [B, J, 3].
    out = out[:, :lanes].reshape(J, 3, B)
    return jnp.transpose(out, (2, 0, 1)).astype(vertices.dtype)


def _reference(vertices, faces, face_ids, bcs):
    # Pure-JAX reference mirroring the PyTorch forward exactly.
    B = vertices.shape[0]
    J = bcs.shape[0]
    vertex_ids = faces[face_ids].reshape(-1)
    triangles = vertices[:, vertex_ids, :].reshape(B, J, 3, 3)
    return (triangles * bcs[None, :, :, None]).sum(axis=2)


def _run_case(key, B, V, F, J):
    k_v, k_f, k_id, k_bc = jax.random.split(key, 4)
    vertices = jax.random.normal(k_v, (B, V, 3), dtype=jnp.float32)
    faces = jax.random.randint(k_f, (F, 3), 0, V, dtype=jnp.int32)
    face_ids = jax.random.randint(k_id, (J,), 0, F, dtype=jnp.int32)
    bcs_raw = jax.random.uniform(k_bc, (J, 3), dtype=jnp.float32) + 0.1
    bcs = bcs_raw / jnp.sum(bcs_raw, axis=-1, keepdims=True)      # barycentric

    out = jax.block_until_ready(joints_from_vertices(vertices, faces, face_ids, bcs))
    ref = _reference(vertices, faces, face_ids, bcs)

    assert out.shape == (B, J, 3), out.shape
    np.testing.assert_allclose(np.asarray(out), np.asarray(ref),
                               rtol=1e-5, atol=1e-5)


if __name__ == "__main__":
    # Small canonical case (single grid step, full-extent blocks).
    _run_case(jax.random.PRNGKey(0), B=2, V=32, F=20, J=8)
    # Larger batch exercising the blocked / padded lane path (grid > 1).
    _run_case(jax.random.PRNGKey(1), B=768, V=64, F=40, J=8)
    print("KERNEL_OK")
</pallas_src>

<mosaic_0001>
module attributes {stable_mosaic.version = 11 : i64} {
  func.func @_extra_joints_kernel(%arg0: i32, %arg1: memref<8x3x1xf32, #tpu.memory_space<vmem>>, %arg2: memref<8x3x6xf32, #tpu.memory_space<vmem>>, %arg3: memref<8x6xf32, #tpu.memory_space<vmem>>) attributes {dimension_semantics = [#tpu.dimension_semantics<parallel>], iteration_bounds = array<i64: 1>, scalar_prefetch = 0 : i64, scratch_operands = 0 : i64, tpu.core_type = #tpu.core_type<tc>, window_params = [{pipeline_mode = #tpu.pipeline_mode<synchronous>, transform_indices = @transform_0, window_bounds = array<i64: 8, 3, 1>}, {transform_indices = @transform_1, window_bounds = array<i64: 8, 3, 6>}, {transform_indices = @transform_2, window_bounds = array<i64: 8, 6>}]} {
    %c0 = arith.constant 0 : index
    %c0_0 = arith.constant 0 : index
    %c0_1 = arith.constant 0 : index
    %0 = vector.load %arg2[%c0, %c0_0, %c0_1] : memref<8x3x6xf32, #tpu.memory_space<vmem>>, vector<8x3x6xf32>
    %c0_2 = arith.constant 0 : index
    %c0_3 = arith.constant 0 : index
    %c0_4 = arith.constant 0 : index
    %1 = vector.load %arg1[%c0_2, %c0_3, %c0_4] : memref<8x3x1xf32, #tpu.memory_space<vmem>>, vector<8x3x1xf32>
    %2 = vector.broadcast %1 : vector<8x3x1xf32> to vector<8x3x6xf32>
    %3 = arith.mulf %0, %2 : vector<8x3x6xf32>
    %cst = arith.constant dense<0.000000e+00> : vector<8x6xf32>
    %4 = vector.multi_reduction <add>, %3, %cst [1] : vector<8x3x6xf32> to vector<8x6xf32>
    %c0_5 = arith.constant 0 : index
    %c0_6 = arith.constant 0 : index
    %5 = vector.load %arg3[%c0_5, %c0_6] : memref<8x6xf32, #tpu.memory_space<vmem>>, vector<8x6xf32>
    tpu.vector_store %arg3[%c0_5, %c0_6], %4 {strides = array<i32>} : memref<8x6xf32, #tpu.memory_space<vmem>>, vector<8x6xf32>,
    return
  }
  func.func @transform_0(%arg0: i32) -> (i32, i32, i32) {
    %c0_i32 = arith.constant 0 : i32
    %c0_i32_0 = arith.constant 0 : i32
    %c0_i32_1 = arith.constant 0 : i32
    %c0_i32_2 = arith.constant 0 : i32
    return %c0_i32, %c0_i32_0, %c0_i32_1 : i32, i32, i32
  }
  func.func @transform_1(%arg0: i32) -> (i32, i32, i32) {
    %c0_i32 = arith.constant 0 : i32
    %c0_i32_0 = arith.constant 0 : i32
    %c0_i32_1 = arith.constant 0 : i32
    return %c0_i32, %c0_i32_0, %arg0 : i32, i32, i32
  }
  func.func @transform_2(%arg0: i32) -> (i32, i32) {
    %c0_i32 = arith.constant 0 : i32
    %c0_i32_0 = arith.constant 0 : i32
    return %c0_i32, %arg0 : i32, i32
  }
}

</mosaic_0001>

<bundles_post_ra>
// kernel: joints_from_vertices.1
= control target key start
LH: loop header
LB: loop body
LE: loop exit
PB: predicated region body
PF: predicated region fallthrough
CT: control target
= control target key end

     0   :  { %v164_v0 = vmov 0   ;;  %vm75_vm0 = vcmask 43008   ;;  %vm140_vm1 = vcmask 1041409   ;;  %vm142_vm2 = vcmask 1042434   ;;  %s239_s0 = inlined_call_operand.vmem [shape: f32[8,3,1], index: 0, kind: input, shape index: {}]   ;;  %s240_s1 = inlined_call_operand.vmem [shape: f32[8,3,6], index: 1, kind: input, shape index: {}]   ;;  %s241_s2 = inlined_call_operand.vmem [shape: f32[8,6], index: 2, kind: output, shape index: {}]  }
   0x1   :  { %163 = vset.pattern.permute.xlu1 %v164_v0  ;;  %162 = vset.pattern.permute.xlu0 %v164_v0  ;;  %v21_v1 = vld [vmem:[%s239_s0 + $0x8] sm:$0x7]  ;;  %v19_v2 = vld [vmem:[%s239_s0] sm:$0x7]  ;;  %v22_v3 = vld [vmem:[%s239_s0 + $0xc] sm:$0x7] }
   0x2   :  { %39 = vperm.xlu1 %163, %v21_v1   ;;  %29 = vperm.xlu0 %162, %v19_v2   ;;  %v20_v4 = vld [vmem:[%s239_s0 + $0x4] sm:$0x7]  ;;  %v24_v5 = vld [vmem:[%s239_s0 + $0x14] sm:$0x7]  ;;  %v23_v6 = vld [vmem:[%s239_s0 + $0x10] sm:$0x7] }
   0x3   :  { %v26_v7 = vld [vmem:[%s239_s0 + $0x1c] sm:$0x7]  ;;  %v25_v8 = vld [vmem:[%s239_s0 + $0x18] sm:$0x7]  ;;  %v13_v9 = vld [vmem:[%s240_s1 + $0x8] sm:$0x7] }
   0x4   :  { %v11_v10 = vld [vmem:[%s240_s1] sm:$0x7]  ;;  %v14_v15 = vld [vmem:[%s240_s1 + $0xc] sm:$0x7]  ;;  %v12_v16 = vld [vmem:[%s240_s1 + $0x4] sm:$0x7] }
   0x5   :  { %v16_v27 = vld [vmem:[%s240_s1 + $0x14] sm:$0x7]  ;;  %v15_v28 = vld [vmem:[%s240_s1 + $0x10] sm:$0x7]  ;;  %v18_v43 = vld [vmem:[%s240_s1 + $0x1c] sm:$0x7] }
   0x6   :  { %44 = vperm.xlu1 %163, %v22_v3   ;;  %34 = vperm.xlu0 %162, %v20_v4   ;;  %v17_v44 = vld [vmem:[%s240_s1 + $0x18] sm:$0x7]  ;;  %vm144_vm3 = vcmask 1043459   ;;  %vm146_vm4 = vcmask 1044484   ;;  %vm148_vm5 = vcmask 1045509   ;;  %vm150_vm6 = vcmask 1046534  }
   0x7   :  { %vm152_vm7 = vcmask 1047559   ;;  %vm155_vm8 = vcmask 48128  }
   0xa   :  { %54 = vperm.xlu1 %163, %v24_v5   ;;  %49 = vperm.xlu0 %162, %v23_v6  }
   0xe   :  { %64 = vperm.xlu1 %163, %v26_v7   ;;  %59 = vperm.xlu0 %162, %v25_v8  }
  0x81   :  { %v40_v11 = vpop.permute.xlu1 %39  ;;  %v30_v12 = vpop.permute.xlu0 %29 }
  0x82   :  { %v69_v13 = vmul.f32 %v40_v11, %v13_v9  ;;  %v67_v14 = vmul.f32 %v30_v12, %v11_v10 }
  0x84   :  { %v90_v17 = vsel %vm75_vm0, %v69_v13, 0.0  ;;  %v76_v18 = vsel %vm75_vm0, %v67_v14, 0.0 }
  0x85   :  { %v91_v19 = vrot.slane %v90_v17, 4  ;;  %v77_v20 = vrot.slane %v76_v18, 4  ;;  %v45_v21 = vpop.permute.xlu1 %44  ;;  %v35_v22 = vpop.permute.xlu0 %34 }
  0x86   :  { %v70_v23 = vmul.f32 %v45_v21, %v14_v15  ;;  %v68_v24 = vmul.f32 %v35_v22, %v12_v16 }
  0x87   :  { %v92_v25 = vadd.f32 %v91_v19, %v90_v17  ;;  %v78_v26 = vadd.f32 %v77_v20, %v76_v18 }
  0x88   :  { %v97_v29 = vsel %vm75_vm0, %v70_v23, 0.0  ;;  %v83_v30 = vsel %vm75_vm0, %v68_v24, 0.0 }
  0x89   :  { %v93_v31 = vrot.slane %v92_v25, 2  ;;  %v79_v32 = vrot.slane %v78_v26, 2  ;;  %v98_v33 = vrot.slane %v97_v29, 4  ;;  %v84_v34 = vrot.slane %v83_v30, 4  ;;  %v55_v35 = vpop.permute.xlu1 %54  ;;  %v50_v36 = vpop.permute.xlu0 %49 }
  0x8a   :  { %v72_v37 = vmul.f32 %v55_v35, %v16_v27  ;;  %v71_v38 = vmul.f32 %v50_v36, %v15_v28 }
  0x8b   :  { %v94_v39 = vadd.f32 %v93_v31, %v92_v25  ;;  %v80_v40 = vadd.f32 %v79_v32, %v78_v26  ;;  %v99_v41 = vadd.f32 %v98_v33, %v97_v29  ;;  %v85_v42 = vadd.f32 %v84_v34, %v83_v30 }
  0x8c   :  { %v111_v45 = vsel %vm75_vm0, %v72_v37, 0.0  ;;  %v104_v46 = vsel %vm75_vm0, %v71_v38, 0.0 }
  0x8d   :  { %v100_v47 = vrot.slane %v99_v41, 2  ;;  %v86_v48 = vrot.slane %v85_v42, 2  ;;  %v65_v49 = vpop.permute.xlu1 %64  ;;  %v60_v50 = vpop.permute.xlu0 %59  ;;  %v112_v51 = vrot.slane %v111_v45, 4  ;;  %v105_v52 = vrot.slane %v104_v46, 4 }
  0x8e   :  { %v74_v53 = vmul.f32 %v65_v49, %v18_v43  ;;  %v73_v54 = vmul.f32 %v60_v50, %v17_v44  ;;  %v95_v55 = vrot.slane %v94_v39, 1  ;;  %v81_v56 = vrot.slane %v80_v40, 1 }
  0x8f   :  { %v101_v57 = vadd.f32 %v100_v47, %v99_v41  ;;  %v87_v58 = vadd.f32 %v86_v48, %v85_v42  ;;  %v113_v59 = vadd.f32 %v112_v51, %v111_v45  ;;  %v106_v60 = vadd.f32 %v105_v52, %v104_v46 }
  0x90   :  { %v125_v61 = vsel %vm75_vm0, %v74_v53, 0.0  ;;  %v118_v62 = vsel %vm75_vm0, %v73_v54, 0.0  ;;  %v82_v5 = vadd.f32 %v81_v56, %v80_v40  ;;  %v96_v9 = vadd.f32 %v95_v55, %v94_v39 }
  0x91   :  { %v102_v63 = vrot.slane %v101_v57, 1  ;;  %v88_v0 = vrot.slane %v87_v58, 1  ;;  %v126_v1 = vrot.slane %v125_v61, 4  ;;  %v119_v2 = vrot.slane %v118_v62, 4 }
  0x92   :  { %v114_v3 = vrot.slane %v113_v59, 2  ;;  %v107_v4 = vrot.slane %v106_v60, 2 }
  0x93   :  { %v89_v6 = vadd.f32 %v88_v0, %v87_v58  ;;  %v127_v7 = vadd.f32 %v126_v1, %v125_v61  ;;  %v120_v8 = vadd.f32 %v119_v2, %v118_v62  ;;  %v103_v12 = vadd.f32 %v102_v63, %v101_v57 }
  0x94   :  { %v115_v10 = vadd.f32 %v114_v3, %v113_v59  ;;  %v108_v11 = vadd.f32 %v107_v4, %v106_v60 }
  0x95   :  { %v141_v13 = vsel %vm140_vm1, %v89_v6, %v82_v5  ;;  %v128_v14 = vrot.slane %v127_v7, 2  ;;  %v121_v15 = vrot.slane %v120_v8, 2 }
  0x96   :  { %v143_v16 = vsel %vm142_vm2, %v96_v9, %v141_v13  ;;  %v116_v17 = vrot.slane %v115_v10, 1  ;;  %v109_v18 = vrot.slane %v108_v11, 1 }
  0x97   :  { %v145_v19 = vsel %vm144_vm3, %v103_v12, %v143_v16  ;;  %v129_v20 = vadd.f32 %v128_v14, %v127_v7  ;;  %v122_v21 = vadd.f32 %v121_v15, %v120_v8 }
  0x98   :  { %v117_v22 = vadd.f32 %v116_v17, %v115_v10  ;;  %v110_v23 = vadd.f32 %v109_v18, %v108_v11 }
  0x99   :  { %v130_v24 = vrot.slane %v129_v20, 1  ;;  %v123_v25 = vrot.slane %v122_v21, 1 }
  0x9a   :  { %v147_v26 = vsel %vm146_vm4, %v110_v23, %v145_v19 }
  0x9b   :  { %v131_v27 = vadd.f32 %v130_v24, %v129_v20  ;;  %v124_v28 = vadd.f32 %v123_v25, %v122_v21  ;;  %v149_v29 = vsel %vm148_vm5, %v117_v22, %v147_v26 }
  0x9d   :  { %v151_v30 = vsel %vm150_vm6, %v124_v28, %v149_v29 }
  0x9e   :  { %v153_v31 = vsel %vm152_vm7, %v131_v27, %v151_v30 }
  0x9f   :  { %156 = vst.msk [vmem:[%s241_s2] sm:$0xff] %vm155_vm8, %v153_v31 }

</bundles_post_ra>
